<compile_context>
chip_gen: v7x
topology: tpu7x:2x2x1
jax: 0.10.0
libtpu: 0.0.40
codegen_flags: <defaults>
</compile_context>

<pallas_src>
import functools

import jax
import jax.numpy as jnp
from jax.experimental import pallas as pl
from jax.experimental.pallas import tpu as pltpu


def _round_up(n: int, m: int) -> int:
    return ((n + m - 1) // m) * m


def _autoencoder_kernel(x_ref, w12_ref, b12_ref, w34_ref, b34_ref, out_ref):
    """Fused forward pass for one batch tile, entirely in VMEM."""
    x = x_ref[...]                                                   # (TB, D_in)

    # encoder (two Linears fused into one matmul) + ReLU
    h = jnp.dot(x, w12_ref[...], preferred_element_type=jnp.float32) + b12_ref[...]
    h = jnp.maximum(h, 0.0)

    # decoder (two Linears fused into one matmul)
    y = jnp.dot(h, w34_ref[...], preferred_element_type=jnp.float32) + b34_ref[...]

    out_ref[...] = y.astype(out_ref.dtype)


def autoencoder_forward(x, params, *, batch_tile=256):
    """x: (B, input_dim) float32.

    params: dict with weights of shape (in, out) (transposed vs. torch) and
    biases of shape (1, out), as produced by `init_params`.
    """
    B, D_in = x.shape

    # ---- Algebraic fusion of the adjacent Linear pairs (exact math) --------
    w12 = jnp.dot(params["w1"], params["w2"])                  # (D_in, half)
    b12 = jnp.dot(params["b1"], params["w2"]) + params["b2"]   # (1, half)
    w34 = jnp.dot(params["w3"], params["w4"])                  # (half, D_in)
    b34 = jnp.dot(params["b3"], params["w4"]) + params["b4"]   # (1, D_in)
    half = int(w12.shape[1])

    # ---- Batch tile selection ----------------------------------------------
    # Multiple of 8 sublanes; as large as `batch_tile` but keep >= 2 grid
    # steps when the batch allows it so v7x's two TensorCores both get work.
    tb_cap = _round_up(B, 8)
    if B > 8:
        tb_cap = max(8, _round_up(-(-B // 2), 8))
    tb = min(_round_up(batch_tile, 8), tb_cap)

    # Ragged batch: zero-pad up to a multiple of the tile, slice afterwards.
    B_pad = _round_up(B, tb)
    x_p = x if B_pad == B else jnp.pad(x, ((0, B_pad - B), (0, 0)))
    grid = (B_pad // tb,)

    def full(arr):
        # Grid-invariant block: whole array, same block every step.
        return pl.BlockSpec(arr.shape, lambda i: (0,) * arr.ndim)

    # ---- VMEM budget / cost estimate ---------------------------------------
    itemsize = jnp.dtype(x.dtype).itemsize
    weight_bytes = sum(int(a.size) * jnp.dtype(a.dtype).itemsize
                       for a in (w12, b12, w34, b34))
    tile_bytes = tb * D_in * itemsize
    # x and out tiles double-buffered + (double-buffered) resident weights
    # + slack; explicit so the kernel stays portable to v7x's 64 MiB VMEM.
    vmem_limit = int(min(32 << 20,
                         max(8 << 20, 4 * tile_bytes + 2 * weight_bytes + (2 << 20))))

    flops = 4 * B_pad * D_in * half                      # two (tb,D)x(D,half) matmuls
    bytes_accessed = 2 * B_pad * D_in * itemsize + weight_bytes

    out = pl.pallas_call(
        _autoencoder_kernel,
        out_shape=jax.ShapeDtypeStruct((B_pad, D_in), x.dtype),
        grid_spec=pltpu.PrefetchScalarGridSpec(
            num_scalar_prefetch=0,
            grid=grid,
            in_specs=[
                pl.BlockSpec((tb, D_in), lambda i: (i, 0)),   # x tile
                full(w12), full(b12),
                full(w34), full(b34),
            ],
            out_specs=pl.BlockSpec((tb, D_in), lambda i: (i, 0)),
        ),
        compiler_params=pltpu.CompilerParams(
            dimension_semantics=("parallel",),
            vmem_limit_bytes=vmem_limit),
        cost_estimate=pl.CostEstimate(flops=flops, transcendentals=0,
                                      bytes_accessed=bytes_accessed),
    )(x_p, w12, b12, w34, b34)

    return out[:B] if B_pad != B else out


def init_params(key, input_dim, encoding_dim, dtype=jnp.float32):
    """Deterministic init mimicking torch.nn.Linear's U(-1/sqrt(fan_in), ...).

    Weights are stored as (in, out) (transposed vs. torch's (out, in))."""
    half = encoding_dim // 2
    dims = [
        ("w1", "b1", input_dim, encoding_dim),
        ("w2", "b2", encoding_dim, half),
        ("w3", "b3", half, encoding_dim),
        ("w4", "b4", encoding_dim, input_dim),
    ]
    params = {}
    for wname, bname, fan_in, fan_out in dims:
        key, kw, kb = jax.random.split(key, 3)
        bound = 1.0 / jnp.sqrt(jnp.asarray(fan_in, dtype))
        params[wname] = jax.random.uniform(kw, (fan_in, fan_out), dtype,
                                           minval=-bound, maxval=bound)
        params[bname] = jax.random.uniform(kb, (1, fan_out), dtype,
                                           minval=-bound, maxval=bound)
    return params


def reference_forward(x, params):
    """Pure-JAX reference in the original PyTorch op order (4 matmuls)."""
    h = x @ params["w1"] + params["b1"]
    h = h @ params["w2"] + params["b2"]
    h = jnp.maximum(h, 0.0)
    h = h @ params["w3"] + params["b3"]
    return h @ params["w4"] + params["b4"]


def reference_forward_fused(x, params):
    """Pure-JAX reference using the same fused op order as the kernel
    (mathematically identical to the PyTorch forward)."""
    w12 = params["w1"] @ params["w2"]
    b12 = params["b1"] @ params["w2"] + params["b2"]
    w34 = params["w3"] @ params["w4"]
    b34 = params["b3"] @ params["w4"] + params["b4"]
    h = jnp.maximum(x @ w12 + b12, 0.0)
    return h @ w34 + b34


if __name__ == "__main__":
    key = jax.random.PRNGKey(0)
    k_param, k_x = jax.random.split(key)

    # Small shapes consistent with the module: x is (batch, input_dim).
    batch, input_dim, encoding_dim = 8, 64, 32

    params = init_params(k_param, input_dim, encoding_dim)
    x = jax.random.normal(k_x, (batch, input_dim), dtype=jnp.float32)

    fwd = jax.jit(functools.partial(autoencoder_forward, batch_tile=256))
    out = fwd(x, params)
    jax.block_until_ready(out)
    assert out.shape == (batch, input_dim)

    # Tight check against the reference computed in the same fused op order.
    ref_fused = reference_forward_fused(x, params)
    assert jnp.allclose(out, ref_fused, atol=1e-5, rtol=1e-5), \
        "mismatch vs fused-order reference"

    # Semantic check against the PyTorch op order (fusion only changes f32/MXU
    # rounding, not the math), hence the slightly looser tolerance.
    ref = reference_forward(x, params)
    assert jnp.allclose(out, ref, atol=5e-3, rtol=5e-3), \
        "mismatch vs PyTorch-order reference"

    # Exercise ragged-batch padding + a multi-step (megacore-shardable) grid.
    x2 = jax.random.normal(jax.random.PRNGKey(1), (10, input_dim), jnp.float32)
    out2 = jax.block_until_ready(fwd(x2, params))
    assert out2.shape == (10, input_dim)
    assert jnp.allclose(out2, reference_forward_fused(x2, params),
                        atol=1e-5, rtol=1e-5), "ragged-batch mismatch"

    print("KERNEL_OK")
</pallas_src>

<mosaic_0001>
module attributes {stable_mosaic.version = 11 : i64} {
  func.func @_autoencoder_kernel(%arg0: i32, %arg1: memref<8x64xf32, #tpu.memory_space<vmem>>, %arg2: memref<64x16xf32, #tpu.memory_space<vmem>>, %arg3: memref<1x16xf32, #tpu.memory_space<vmem>>, %arg4: memref<16x64xf32, #tpu.memory_space<vmem>>, %arg5: memref<1x64xf32, #tpu.memory_space<vmem>>, %arg6: memref<8x64xf32, #tpu.memory_space<vmem>>) attributes {dimension_semantics = [#tpu.dimension_semantics<parallel>], iteration_bounds = array<i64: 1>, scalar_prefetch = 0 : i64, scratch_operands = 0 : i64, tpu.core_type = #tpu.core_type<tc>, window_params = [{transform_indices = @transform_0, window_bounds = array<i64: 8, 64>}, {pipeline_mode = #tpu.pipeline_mode<synchronous>, transform_indices = @transform_1, window_bounds = array<i64: 64, 16>}, {pipeline_mode = #tpu.pipeline_mode<synchronous>, transform_indices = @transform_2, window_bounds = array<i64: 1, 16>}, {pipeline_mode = #tpu.pipeline_mode<synchronous>, transform_indices = @transform_3, window_bounds = array<i64: 16, 64>}, {pipeline_mode = #tpu.pipeline_mode<synchronous>, transform_indices = @transform_4, window_bounds = array<i64: 1, 64>}, {transform_indices = @transform_5, window_bounds = array<i64: 8, 64>}]} {
    %c0 = arith.constant 0 : index
    %c0_0 = arith.constant 0 : index
    %0 = vector.load %arg1[%c0, %c0_0] : memref<8x64xf32, #tpu.memory_space<vmem>>, vector<8x64xf32>
    %c0_1 = arith.constant 0 : index
    %c0_2 = arith.constant 0 : index
    %1 = vector.load %arg2[%c0_1, %c0_2] : memref<64x16xf32, #tpu.memory_space<vmem>>, vector<64x16xf32>
    %cst = arith.constant dense<0.000000e+00> : vector<8x16xf32>
    %2 = tpu.matmul %0, %1, %cst {dimension_numbers = #tpu.dot_dimension_numbers<[1], [0], [0], [1], [0, 0, 1, 1], [], []>} : vector<8x64xf32>, vector<64x16xf32>, vector<8x16xf32> -> vector<8x16xf32>
    %c0_3 = arith.constant 0 : index
    %c0_4 = arith.constant 0 : index
    %3 = vector.load %arg3[%c0_3, %c0_4] : memref<1x16xf32, #tpu.memory_space<vmem>>, vector<1x16xf32>
    %4 = vector.broadcast %3 : vector<1x16xf32> to vector<8x16xf32>
    %5 = arith.addf %2, %4 : vector<8x16xf32>
    %cst_5 = arith.constant 0.000000e+00 : f32
    %6 = vector.broadcast %cst_5 : f32 to vector<8x16xf32>
    %7 = arith.maximumf %5, %6 : vector<8x16xf32>
    %c0_6 = arith.constant 0 : index
    %c0_7 = arith.constant 0 : index
    %8 = vector.load %arg4[%c0_6, %c0_7] : memref<16x64xf32, #tpu.memory_space<vmem>>, vector<16x64xf32>
    %cst_8 = arith.constant dense<0.000000e+00> : vector<8x64xf32>
    %9 = tpu.matmul %7, %8, %cst_8 {dimension_numbers = #tpu.dot_dimension_numbers<[1], [0], [0], [1], [0, 0, 1, 1], [], []>} : vector<8x16xf32>, vector<16x64xf32>, vector<8x64xf32> -> vector<8x64xf32>
    %c0_9 = arith.constant 0 : index
    %c0_10 = arith.constant 0 : index
    %10 = vector.load %arg5[%c0_9, %c0_10] : memref<1x64xf32, #tpu.memory_space<vmem>>, vector<1x64xf32>
    %11 = vector.broadcast %10 : vector<1x64xf32> to vector<8x64xf32>
    %12 = arith.addf %9, %11 : vector<8x64xf32>
    %c0_11 = arith.constant 0 : index
    %c0_12 = arith.constant 0 : index
    %13 = vector.load %arg6[%c0_11, %c0_12] : memref<8x64xf32, #tpu.memory_space<vmem>>, vector<8x64xf32>
    tpu.vector_store %arg6[%c0_11, %c0_12], %12 {strides = array<i32>} : memref<8x64xf32, #tpu.memory_space<vmem>>, vector<8x64xf32>,
    return
  }
  func.func @transform_0(%arg0: i32) -> (i32, i32) {
    %c0_i32 = arith.constant 0 : i32
    %c0_i32_0 = arith.constant 0 : i32
    return %arg0, %c0_i32 : i32, i32
  }
  func.func @transform_1(%arg0: i32) -> (i32, i32) {
    %c0_i32 = arith.constant 0 : i32
    %c0_i32_0 = arith.constant 0 : i32
    %c0_i32_1 = arith.constant 0 : i32
    return %c0_i32, %c0_i32_0 : i32, i32
  }
  func.func @transform_2(%arg0: i32) -> (i32, i32) {
    %c0_i32 = arith.constant 0 : i32
    %c0_i32_0 = arith.constant 0 : i32
    %c0_i32_1 = arith.constant 0 : i32
    return %c0_i32, %c0_i32_0 : i32, i32
  }
  func.func @transform_3(%arg0: i32) -> (i32, i32) {
    %c0_i32 = arith.constant 0 : i32
    %c0_i32_0 = arith.constant 0 : i32
    %c0_i32_1 = arith.constant 0 : i32
    return %c0_i32, %c0_i32_0 : i32, i32
  }
  func.func @transform_4(%arg0: i32) -> (i32, i32) {
    %c0_i32 = arith.constant 0 : i32
    %c0_i32_0 = arith.constant 0 : i32
    %c0_i32_1 = arith.constant 0 : i32
    return %c0_i32, %c0_i32_0 : i32, i32
  }
  func.func @transform_5(%arg0: i32) -> (i32, i32) {
    %c0_i32 = arith.constant 0 : i32
    %c0_i32_0 = arith.constant 0 : i32
    return %arg0, %c0_i32 : i32, i32
  }
}

</mosaic_0001>

<bundles_post_ra>
// kernel: autoencoder_forward.1
= control target key start
LH: loop header
LB: loop body
LE: loop exit
PB: predicated region body
PF: predicated region fallthrough
CT: control target
= control target key end

     0   :  { %v295_v3 = vmov 0.0|0.0   ;;  %vm296_vm0 = vmmov 0   ;;  %v297_v6 = vmov 0.0   ;;  %s382_s0 = inlined_call_operand.vmem [shape: f32[8,64], index: 0, kind: input, shape index: {}]   ;;  %s383_s1 = inlined_call_operand.vmem [shape: f32[64,16], index: 1, kind: input, shape index: {}]   ;;  %s384_s2 = inlined_call_operand.vmem [shape: f32[1,16], index: 2, kind: input, shape index: {}]   ;;  %s385_s3 = inlined_call_operand.vmem [shape: f32[16,64], index: 3, kind: input, shape index: {}]   ;;  %s386_s4 = inlined_call_operand.vmem [shape: f32[1,64], index: 4, kind: input, shape index: {}]   ;;  %s387_s5 = inlined_call_operand.hbm [shape: f32[8,64], index: 5, kind: output, shape index: {}]  }
   0x1   :  { %v22_v0 = vld [vmem:[%s383_s1] sm:$0xff]  ;;  %v23_v1 = vld [vmem:[%s383_s1 + $0x8] sm:$0xff]  ;;  %v24_v2 = vld [vmem:[%s383_s1 + $0x10] sm:$0xff]  ;;  %252 = vmatprep.subr.bf16.mxu0 %v295_v3  ;;  %242 = vmatprep.mubr.msk.f32.mxu0 %vm296_vm0, %v297_v6 }
   0x2   :  { %v253_v4 = vpack.c.bf16 %v23_v1, %v22_v0  ;;  %v25_v5 = vld [vmem:[%s383_s1 + $0x18] sm:$0xff]  ;;  %264 = vmatprep.subr.bf16.mxu1 %v295_v3  ;;  %249 = vmatprep.mubr.msk.f32.mxu1 %vm296_vm0, %v297_v6 }
   0x3   :  { %v256_v7 = vpack.c.bf16 %v25_v5, %v24_v2 }
   0x4   :  { %254 = vmatpush3.bf16.msra.mxu0 %v253_v4 }
   0x5   :  { %10 = vsyncpa [#allocation3], 0  ;;  %255 = vmatprep.subr.bf16.mxu0 %v295_v3  ;;  %v26_v8 = vld [vmem:[%s383_s1 + $0x20] sm:$0xff]  ;;  %v27_v9 = vld [vmem:[%s383_s1 + $0x28] sm:$0xff]  ;;  %vm37_vm1 = vcmask 523264   ;;  %vm121_vm2 = vcmask 130048  }
   0x6   :  { %v259_v10 = vpack.c.bf16 %v27_v9, %v26_v8  ;;  %v28_v11 = vld [vmem:[%s383_s1 + $0x30] sm:$0xff]  ;;  %v29_v12 = vld [vmem:[%s383_s1 + $0x38] sm:$0xff]  ;;  %v21_v14 = vld [vmem:[%s382_s0] sm:$0xff]  ;;  %s298_s17 = smov [#allocation2]  }
   0x7   :  { %v262_v13 = vpack.c.bf16 %v29_v12, %v28_v11  ;;  %v112_v15 = vld [vmem:[%s385_s3] sm:$0xff]  ;;  %v113_v16 = vld [vmem:[%s385_s3 + $0x8] sm:$0xff]  ;;  %s202_s18 = sshll.u32 %s298_s17, 4  ;;  %s203_s18 = int_to_ptr.vmem [resolvable:$true] %s202_s18 }
   0x8   :  { %257 = vmatpush3.bf16.msra.mxu0 %v256_v7  ;;  %v265_v17 = vpack.c.bf16 %v113_v16, %v112_v15  ;;  %v210_v18 = vld [vmem:[%s384_s2] ss:$0 sm:$0xff]  ;;  %s271_s3 = scalar_lea.vmem %s203_s18, 128  ;;  %p276_p1 = scmp.lt.s32.totalorder %s203_s18, %s203_s18 }
   0x9   :  { %258 = vmatprep.subr.bf16.mxu0 %v295_v3  ;;  %v212_v23 = vld [vmem:[%s386_s4] ss:$0 sm:$0xff]  ;;  %p272_p0 = scmp.ne.s32.totalorder %s203_s18, %s271_s3  ;;  %p277_p2 = scmp.lt.s32.totalorder %s271_s3, %s271_s3 }
   0xa   :  { %266 = vmatpush3.bf16.msra.mxu1 %v265_v17 }
   0xb   :  { %p278_p3 = por %p277_p2, %p276_p1 }
   0xc   :  { %260 = vmatpush3.bf16.msra.mxu0 %v259_v10 }
   0xd   :  { %261 = vmatprep.subr.bf16.mxu0 %v295_v3  ;;  %p279_p4 = pnand %p278_p3, %p272_p0 }
  0x10   :  { %263 = vmatpush3.bf16.msra.mxu0 %v262_v13 }
  0x13   :  { %243 = vmatmul.mubr.msk.f32.vlgmr.msra.gmra.mrb[0].mxu0 %vm37_vm1, %v21_v14 }
  0xe6   :  { %v107_v19 = vpop.f32.mrb[0].mxu0 }
  0xe7   :  { %v108_v20 = vadd.f32 %v210_v18, %v107_v19  ;;  %v244_v21 = vpop.f32.mrb[1].mxu0 }
  0xe9   :  { %v111_v22 = vmax.f32 %v108_v20, 0.0 }
  0xeb   :  { %250 = vmatmul.mubr.msk.f32.vlgmr.msra.gmra.mrb[0].mxu1 %vm121_vm2, %v111_v22 }
 0x1be   :  { %v191_v24 = vpop.f32.mrb[0].mxu1 }
 0x1bf   :  { %v192_v25 = vadd.f32 %v212_v23, %v191_v24  ;;  %v251_v26 = vpop.f32.mrb[1].mxu1 }
 0x1c1   :  { %195 = vst.msk [vmem:[#allocation2] sm:$0xff] %vm37_vm1, %v192_v25 }
 0x1c2   :  { %282 = shalt.err (!%p279_p4)
}
 0x1c3   :  { %s283_s20 = scalar_lea.hbm %s387_s5, 128 }
 0x1c4   :  { %p284_p5 = scmp.ne.s32.totalorder %s387_s5, %s283_s20  ;;  %p287_p6 = scmp.lt.u32.totalorder %s283_s20, %s387_s5 }
 0x1c6   :  { %p289_p7 = pnand %p287_p6, %p284_p5 }
 0x1c8   :  { %292 = shalt.err (!%p289_p7)
}
 0x1c9   :  { %205 = dma.vmem_to_hbm [thread:$0]  %s203_s18, 128, %s387_s5, [#allocation3]  }
 0x1ca   :  { %293 = dma.done.wait [#allocation3], 128  }
 0x1cb   :  { %294 = vsyncadd [#allocation3], 4294967168 }
 0x1cc   :  { %209 = vsyncpa [#allocation3], 1 }

</bundles_post_ra>
